<compile_context>
chip_gen: v7x
topology: tpu7x:2x2x1
jax: 0.10.0
libtpu: 0.0.40
codegen_flags: <defaults>
</compile_context>

<pallas_src>
import functools

import jax
import jax.numpy as jnp
from jax.experimental import pallas as pl
from jax.experimental.pallas import tpu as pltpu

C_IN = 64
C_OUT = 64
KSIZE = 3


def _conv_relu_kernel(x_ref, w_ref, o_ref, *, img_w: int, tile_rows: int):
    # x_ref: (1, (H+2)*W, 3*C_IN) bf16  -- zero-padded, kx-folded NHWC image of one batch elem
    #         flat pixel index = padded_row * W + col ; channel index = kx*C_IN + cin
    # w_ref: (KSIZE, 3*C_IN, C_OUT) bf16 -- ky-major; each (192, 64) slab is kx-major/cin-minor
    # o_ref: (1, TH*W, C_OUT)            -- output row tile, flat pixel index = row*W + col
    m = o_ref.shape[1]                      # TH * W output pixels in this tile
    row0 = pl.program_id(1) * tile_rows     # first output row of this tile

    acc = None
    for ky in range(KSIZE):
        start = (row0 + ky) * img_w
        if img_w % 8 == 0:
            start = pl.multiple_of(start, 8)   # sublane-aligned dynamic slice
        # (TH*W, 3*C_IN) window: padded rows row0+ky .. row0+ky+TH-1, all W columns.
        win = x_ref[0, pl.ds(start, m), :]
        contrib = jnp.dot(win, w_ref[ky], preferred_element_type=jnp.float32)
        acc = contrib if acc is None else acc + contrib

    # Fused ReLU in f32, cast to output dtype, single full-block store.
    o_ref[0] = jnp.maximum(acc, 0.0).astype(o_ref.dtype)


def conv_relu_block(x_nchw, w_oihw):
    """Forward pass of Conv_ReLU_Block. x_nchw: (N, 64, H, W), w_oihw: (64, 64, 3, 3)."""
    N, C, H, W = x_nchw.shape
    assert C == C_IN and w_oihw.shape == (C_OUT, C_IN, KSIZE, KSIZE)
    out_dtype = x_nchw.dtype

    # Row-tile height: multiple of 8 dividing H (keeps blocks sublane-aligned); else whole image.
    TH = 8 if (H % 8 == 0 and H > 8) else H
    n_h = H // TH

    # NCHW -> NHWC, bf16 operands, SAME zero padding for the 3x3/stride-1 conv.
    x = jnp.transpose(x_nchw, (0, 2, 3, 1)).astype(jnp.bfloat16)
    xp = jnp.pad(x, ((0, 0), (1, 1), (1, 1), (0, 0)))           # (N, H+2, W+2, 64)
    # Fold the 3 kx taps into the channel (contraction) dim: (N, H+2, W, 192), kx-major.
    xs = jnp.concatenate([xp[:, :, kx:kx + W, :] for kx in range(KSIZE)], axis=-1)
    xs = xs.reshape(N, (H + 2) * W, KSIZE * C_IN)

    # OIHW -> (ky, kx, cin, cout) -> (ky, kx*cin, cout): matches the kx-major/cin-minor folding.
    w = jnp.transpose(w_oihw, (2, 3, 1, 0)).reshape(KSIZE, KSIZE * C_IN, C_OUT)
    w = w.astype(jnp.bfloat16)

    kernel = functools.partial(_conv_relu_kernel, img_w=W, tile_rows=TH)

    out_flat = pl.pallas_call(
        kernel,
        out_shape=jax.ShapeDtypeStruct((N, H * W, C_OUT), out_dtype),
        grid_spec=pltpu.PrefetchScalarGridSpec(
            num_scalar_prefetch=0,
            grid=(N, n_h),
            in_specs=[
                # Full padded/folded image of batch n; block index ignores the row-tile axis,
                # so the image stays VMEM-resident across that axis (no re-DMA per tile).
                pl.BlockSpec((1, (H + 2) * W, KSIZE * C_IN), lambda n, h: (n, 0, 0)),
                # Weights resident for the whole kernel.
                pl.BlockSpec((KSIZE, KSIZE * C_IN, C_OUT), lambda n, h: (0, 0, 0)),
            ],
            out_specs=pl.BlockSpec((1, TH * W, C_OUT), lambda n, h: (n, h, 0)),
        ),
        compiler_params=pltpu.CompilerParams(
            dimension_semantics=("parallel", "arbitrary"),
            vmem_limit_bytes=48 * 1024 * 1024,  # < 64 MiB (v7x) and < 128 MiB (v5e/v6e)
        ),
    )(xs, w)

    out_nhwc = out_flat.reshape(N, H, W, C_OUT)
    return jnp.transpose(out_nhwc, (0, 3, 1, 2))  # NHWC -> NCHW


if __name__ == "__main__":
    key = jax.random.PRNGKey(0)
    kx_key, kw_key = jax.random.split(key)

    # The module fixes channels at 64; keep batch/spatial small.
    N, H, W = 2, 16, 16
    x = jax.random.normal(kx_key, (N, C_IN, H, W), dtype=jnp.float32)
    w = jax.random.normal(kw_key, (C_OUT, C_IN, KSIZE, KSIZE), dtype=jnp.float32) * 0.05

    out = conv_relu_block(x, w)
    out = jax.block_until_ready(out)
    assert out.shape == (N, C_OUT, H, W)

    # Check vs XLA conv + ReLU on the same bf16-rounded operands the kernel uses
    # (isolates kernel correctness from the intentional bf16 operand quantization).
    xq = x.astype(jnp.bfloat16).astype(jnp.float32)
    wq = w.astype(jnp.bfloat16).astype(jnp.float32)
    ref = jax.lax.conv_general_dilated(
        xq, wq, window_strides=(1, 1), padding="SAME",
        dimension_numbers=("NCHW", "OIHW", "NCHW"))
    ref = jnp.maximum(ref, 0.0)
    assert jnp.allclose(out, ref, atol=1e-2, rtol=1e-2), "mismatch vs bf16-operand reference"

    # Looser sanity check vs the full-f32 reference (difference = bf16 operand rounding only).
    ref_f32 = jnp.maximum(
        jax.lax.conv_general_dilated(
            x, w, window_strides=(1, 1), padding="SAME",
            dimension_numbers=("NCHW", "OIHW", "NCHW")),
        0.0)
    assert jnp.allclose(out, ref_f32, atol=5e-2, rtol=5e-2), "mismatch vs f32 reference"

    print("KERNEL_OK")
</pallas_src>

<mosaic_0001>
module attributes {stable_mosaic.version = 11 : i64} {
  func.func @_conv_relu_kernel(%arg0: i32, %arg1: i32, %arg2: memref<1x288x192xbf16, #tpu.memory_space<vmem>>, %arg3: memref<3x192x64xbf16, #tpu.memory_space<vmem>>, %arg4: memref<1x128x64xf32, #tpu.memory_space<vmem>>) attributes {dimension_semantics = [#tpu.dimension_semantics<parallel>, #tpu.dimension_semantics<arbitrary>], iteration_bounds = array<i64: 2, 2>, scalar_prefetch = 0 : i64, scratch_operands = 0 : i64, tpu.core_type = #tpu.core_type<tc>, window_params = [{transform_indices = @transform_0, window_bounds = array<i64: 1, 288, 192>}, {pipeline_mode = #tpu.pipeline_mode<synchronous>, transform_indices = @transform_1, window_bounds = array<i64: 3, 192, 64>}, {transform_indices = @transform_2, window_bounds = array<i64: 1, 128, 64>}]} {
    %c8_i32 = arith.constant 8 : i32
    %0 = arith.muli %arg1, %c8_i32 : i32
    %c0_i32 = arith.constant 0 : i32
    %1 = arith.addi %0, %c0_i32 : i32
    %c16_i32 = arith.constant 16 : i32
    %2 = arith.muli %1, %c16_i32 : i32
    %3 = tpu.assume_multiple %2, 8 : i32
    %c0 = arith.constant 0 : index
    %4 = arith.index_cast %3 : i32 to index
    %c0_0 = arith.constant 0 : index
    %5 = vector.load %arg2[%c0, %4, %c0_0] : memref<1x288x192xbf16, #tpu.memory_space<vmem>>, vector<1x128x192xbf16>
    %6 = vector.shape_cast %5 : vector<1x128x192xbf16> to vector<128x192xbf16>
    %c0_1 = arith.constant 0 : index
    %c0_2 = arith.constant 0 : index
    %c0_3 = arith.constant 0 : index
    %7 = vector.load %arg3[%c0_1, %c0_2, %c0_3] : memref<3x192x64xbf16, #tpu.memory_space<vmem>>, vector<1x192x64xbf16>
    %8 = vector.shape_cast %7 : vector<1x192x64xbf16> to vector<192x64xbf16>
    %cst = arith.constant dense<0.000000e+00> : vector<128x64xf32>
    %9 = tpu.matmul %6, %8, %cst {dimension_numbers = #tpu.dot_dimension_numbers<[1], [0], [0], [1], [0, 0, 1, 1], [], []>} : vector<128x192xbf16>, vector<192x64xbf16>, vector<128x64xf32> -> vector<128x64xf32>
    %c1_i32 = arith.constant 1 : i32
    %10 = arith.addi %0, %c1_i32 : i32
    %c16_i32_4 = arith.constant 16 : i32
    %11 = arith.muli %10, %c16_i32_4 : i32
    %12 = tpu.assume_multiple %11, 8 : i32
    %c0_5 = arith.constant 0 : index
    %13 = arith.index_cast %12 : i32 to index
    %c0_6 = arith.constant 0 : index
    %14 = vector.load %arg2[%c0_5, %13, %c0_6] : memref<1x288x192xbf16, #tpu.memory_space<vmem>>, vector<1x128x192xbf16>
    %15 = vector.shape_cast %14 : vector<1x128x192xbf16> to vector<128x192xbf16>
    %c1 = arith.constant 1 : index
    %c0_7 = arith.constant 0 : index
    %c0_8 = arith.constant 0 : index
    %16 = vector.load %arg3[%c1, %c0_7, %c0_8] : memref<3x192x64xbf16, #tpu.memory_space<vmem>>, vector<1x192x64xbf16>
    %17 = vector.shape_cast %16 : vector<1x192x64xbf16> to vector<192x64xbf16>
    %cst_9 = arith.constant dense<0.000000e+00> : vector<128x64xf32>
    %18 = tpu.matmul %15, %17, %cst_9 {dimension_numbers = #tpu.dot_dimension_numbers<[1], [0], [0], [1], [0, 0, 1, 1], [], []>} : vector<128x192xbf16>, vector<192x64xbf16>, vector<128x64xf32> -> vector<128x64xf32>
    %19 = arith.addf %9, %18 : vector<128x64xf32>
    %c2_i32 = arith.constant 2 : i32
    %20 = arith.addi %0, %c2_i32 : i32
    %c16_i32_10 = arith.constant 16 : i32
    %21 = arith.muli %20, %c16_i32_10 : i32
    %22 = tpu.assume_multiple %21, 8 : i32
    %c0_11 = arith.constant 0 : index
    %23 = arith.index_cast %22 : i32 to index
    %c0_12 = arith.constant 0 : index
    %24 = vector.load %arg2[%c0_11, %23, %c0_12] : memref<1x288x192xbf16, #tpu.memory_space<vmem>>, vector<1x128x192xbf16>
    %25 = vector.shape_cast %24 : vector<1x128x192xbf16> to vector<128x192xbf16>
    %c2 = arith.constant 2 : index
    %c0_13 = arith.constant 0 : index
    %c0_14 = arith.constant 0 : index
    %26 = vector.load %arg3[%c2, %c0_13, %c0_14] : memref<3x192x64xbf16, #tpu.memory_space<vmem>>, vector<1x192x64xbf16>
    %27 = vector.shape_cast %26 : vector<1x192x64xbf16> to vector<192x64xbf16>
    %cst_15 = arith.constant dense<0.000000e+00> : vector<128x64xf32>
    %28 = tpu.matmul %25, %27, %cst_15 {dimension_numbers = #tpu.dot_dimension_numbers<[1], [0], [0], [1], [0, 0, 1, 1], [], []>} : vector<128x192xbf16>, vector<192x64xbf16>, vector<128x64xf32> -> vector<128x64xf32>
    %29 = arith.addf %19, %28 : vector<128x64xf32>
    %cst_16 = arith.constant 0.000000e+00 : f32
    %30 = vector.broadcast %cst_16 : f32 to vector<128x64xf32>
    %31 = arith.maximumf %29, %30 : vector<128x64xf32>
    %c0_17 = arith.constant 0 : index
    %c0_18 = arith.constant 0 : index
    %c0_19 = arith.constant 0 : index
    %32 = vector.load %arg4[%c0_17, %c0_18, %c0_19] : memref<1x128x64xf32, #tpu.memory_space<vmem>>, vector<1x128x64xf32>
    %33 = vector.shape_cast %32 : vector<1x128x64xf32> to vector<128x64xf32>
    %34 = vector.shape_cast %31 : vector<128x64xf32> to vector<1x128x64xf32>
    tpu.vector_store %arg4[%c0_17, %c0_18, %c0_19], %34 {strides = array<i32>} : memref<1x128x64xf32, #tpu.memory_space<vmem>>, vector<1x128x64xf32>,
    return
  }
  func.func @transform_0(%arg0: i32, %arg1: i32) -> (i32, i32, i32) {
    %c0_i32 = arith.constant 0 : i32
    %c0_i32_0 = arith.constant 0 : i32
    %c0_i32_1 = arith.constant 0 : i32
    return %arg0, %c0_i32, %c0_i32_0 : i32, i32, i32
  }
  func.func @transform_1(%arg0: i32, %arg1: i32) -> (i32, i32, i32) {
    %c0_i32 = arith.constant 0 : i32
    %c0_i32_0 = arith.constant 0 : i32
    %c0_i32_1 = arith.constant 0 : i32
    %c0_i32_2 = arith.constant 0 : i32
    return %c0_i32, %c0_i32_0, %c0_i32_1 : i32, i32, i32
  }
  func.func @transform_2(%arg0: i32, %arg1: i32) -> (i32, i32, i32) {
    %c0_i32 = arith.constant 0 : i32
    %c0_i32_0 = arith.constant 0 : i32
    return %arg0, %arg1, %c0_i32 : i32, i32, i32
  }
}

</mosaic_0001>

<bundles_post_ra>
// kernel: tpu_custom_call.1
= control target key start
LH: loop header
LB: loop body
LE: loop exit
PB: predicated region body
PF: predicated region fallthrough
CT: control target
= control target key end

     0   :  { %7 = vsyncpa [#allocation3], 0  ;;  %s2282_s0 = inlined_call_operand.hbm [shape: bf16[2,288,192], index: 0, kind: input, shape index: {}]   ;;  %s2283_s1 = inlined_call_operand.vmem [shape: bf16[3,192,64], index: 1, kind: input, shape index: {}]   ;;  %s2284_s2 = inlined_call_operand.vmem [shape: f32[2,256,64], index: 2, kind: output, shape index: {}]  }
   0x1   :  { %9 = vsyncpa [#allocation3 + $0x1], 0  ;;  %s1828_s9 = smov 0   ;;  %s1830_s10 = smov 0  }
   0x2   :  { %s1832_s11 = smov 0   ;;  %s1834_s12 = smov 0  }
   0x3   :  { %s1836_s13 = smov 0   ;;  %s1838_s14 = smov 0  }
   0x4   :  { %s1840_s15 = smov 0   ;;  %s1842_s16 = smov 0  }
   0x5 LB: > { %s1276_s17 = sadd.s32 4294967295, %s1807_s16   ;;  %s24_s18 = sadd.s32 1, %s1799_s14  ;;  %s1807_s16 = sphi %s1842_s16, %s15_s16   ;;  %s1803_s15 = sphi %s1840_s15, %s2293_s15   ;;  %s1799_s14 = sphi %s1838_s14, %s2292_s14   ;;  %s1795_s13 = sphi %s1836_s13, %s2291_s13   ;;  %s1791_s12 = sphi %s1834_s12, %s2290_s12   ;;  %s1787_s11 = sphi %s1832_s11, %s2289_s11   ;;  %s1783_s10 = sphi %s1830_s10, %s2288_s10   ;;  %s1779_s9 = sphi %s1828_s9, %s2287_s9  }
   0x6   : > { %p25_p0 = scmp.ge.s32.totalorder %s24_s18, 2  ;;  %s27_s19 = sadd.s32 1, %s1803_s15 }
   0x7   : > { %s34_s20 = sadd.s32 1, %s1787_s11  ;;  %p41_p1 = scmp.ne.s32.totalorder %s1787_s11, %s1783_s10 }
   0x8   : > { %s2295_s18 = smov (%p25_p0, %s24_s18), 0  ;;  %s2297_s19 = smov (!%p25_p0, %s27_s19), %s1803_s15 }
   0x9   : > { %p42_p2 = scmp.eq.s32.totalorder %s1807_s16, 0  ;;  %p47_p3 = scmp.ne.s32.totalorder %s1783_s10, %s1779_s9 }
   0xa   : > { %p29_p4 = scmp.ge.s32.totalorder %s2297_s19, 2  ;;  %p48_p5 = scmp.eq.s32.totalorder %s1276_s17, 0 }
   0xb   : > { %p43_p6 = por %p42_p2, %p41_p1  ;;  %p1535_p8 = scmp.lt.s32.totalorder %s1807_s16, 4 }
   0xc   : > { %s2299_s19 = smov (%p29_p4, %s2297_s19), 0  ;;  %p1879_p7 = por %p48_p5, %p47_p3 }
   0xd   : > { %s31_s22 = ssub.s32 %s1803_s15, %s2299_s19  ;;  %s123_s23 = sand.u32 1, %s1787_s11  }
   0xe   : > { %p32_p9 = scmp.eq.s32.totalorder %s31_s22, 0  ;;  %s1526_s24 = smul.u32 288, %s123_s23 }
   0xf   : > { %p1887_p10 = pnand %p1535_p8, %p43_p6  ;;  %s1527_s27 = smul.u32 4608, %s1803_s15 }
  0x10   : > { %s1892_s26 = scalar_select %p32_p9, %s1787_s11, %s34_s20  }
  0x11   : > { %s127_s28 = scalar_lea.vmem [#allocation2], %s1526_s24  ;;  %s1898_s4 = scalar_lea.hbm %s2282_s0, %s1527_s27 }
  0x12   : > { %s134_s29 = sshll.u32 %s127_s28, 4  ;;  %s1902_s5 = scalar_lea.sflag [#allocation3], %s123_s23  ;;  %s1900_s29 = int_to_ptr.vmem [resolvable:$true] %s134_s29 }
  0x13   : > { %s1711_s6 = scalar_lea.hbm %s1898_s4, 4608  ;;  %p1713_p12 = pneg %p1887_p10 }
  0x14   : > { %p1712_p11 = scmp.ne.s32.totalorder %s1898_s4, %s1711_s6  ;;  %s1716_s9 = scalar_lea.hbm %s2282_s0, 9216 }
  0x15   : > { %p1717_p1 = scmp.lt.u32.totalorder %s1898_s4, %s2282_s0  ;;  %p1718_p2 = scmp.lt.u32.totalorder %s1716_s9, %s1711_s6 }
  0x16   : > { %p1714_p13 = pnand %p1713_p12, %p1712_p11  ;;  %p1720_p4 = scmp.lt.u32.totalorder %s1711_s6, %s1898_s4 }
  0x17   : > { %p1719_p3 = por %p1718_p2, %p1717_p1 }
  0x18   : > { %p1715_p0 = pneg %p1714_p13 }
  0x19   : > { %p1721_p5 = por %p1720_p4, %p1719_p3 }
  0x1b   : > { %p1722_p6 = pnand %p1721_p5, %p1715_p0 }
  0x1d   : > { %1725 = shalt.err (!%p1722_p6)
}
  0x1e   : > { %s1726_s22 = scalar_lea.vmem %s1900_s29, 4608  ;;  %s1809_s23 = smov [#allocation2]  }
  0x1f   : > { %p1727_p8 = scmp.ne.s32.totalorder %s1900_s29, %s1726_s22  ;;  %s1731_s24 = sshll.u32 %s1809_s23, 4  ;;  %s1732_s24 = int_to_ptr.vmem [resolvable:$false] %s1731_s24 }
  0x20   : > { %s1733_s27 = scalar_lea.vmem %s1732_s24, 9216  ;;  %p1734_p13 = scmp.lt.s32.totalorder %s1900_s29, %s1732_s24 }
  0x21   : > { %p1729_p9 = pnand %p1727_p8, %p1713_p12  ;;  %p1735_p1 = scmp.lt.s32.totalorder %s1733_s27, %s1726_s22 }
  0x23   : > { %p1730_p11 = pneg %p1729_p9  ;;  %p1736_p2 = por %p1735_p1, %p1734_p13 }
  0x25   : > { %p1737_p3 = pnand %p1736_p2, %p1730_p11 }
  0x27   : > { %1740 = shalt.err (!%p1737_p3)
}
  0x28   : > { %s1810_s28 = smov 128   ;;  %s1811_s30 = smov 8  }
  0x29   : > { %1534 = dma.hbm_to_vmem [thread:$0]  (!%p1887_p10), %s1898_s4, 4608, %s1900_s29, %s1902_s5, %s1810_s28, %s1810_s28, %s1811_s30  }
  0x2a   : > { %p1281_p12 = scmp.ge.s32.totalorder %s1807_s16, 1  ;;  %p142_p0 = scmp.lt.s32.totalorder %s1807_s16, 5 }
  0x2c   : > { %p143_p4 = pnand %p1281_p12, %p142_p0 }
  0x2d   : > { %s148_s3 = sand.u32 (!%p143_p4), 1, %s1783_s10  }
  0x2e   : > { %146 = sbr.rel (%p143_p4) target bundleno = 410 (0x19a), region = 28  ;;  %s149_s7 = scalar_lea.sflag (!%p143_p4), [#allocation3], %s148_s3 }
  0x2f   : > { %s1528_s6 = smul.u32 (!%p143_p4), 288, %s148_s3 }
  0x31   : > { %s1933_s8 = scalar_lea.vmem (!%p143_p4), [#allocation2], %s1528_s6 }
  0x35   : > { %1774 = dma.done.wait (%p1879_p7), %s149_s7, 4608  }
  0x36   : > { %1776 = vsyncadd (%p1879_p7), %s149_s7, 4294962688  ;;  %v1812_v0 = vmov 0   ;;  %v1603_v1 = vld [vmem:[%s2283_s1 + $0x60] sm:$0xff]   ;;  %v1605_v3 = vld [vmem:[%s2283_s1 + $0x68] sm:$0xff]   ;;  %s1967_s3 = sshll.u32 %s1791_s12, 7  ;;  %vm427_vm0 = vcmask 523264  }
  0x37   : > { %452 = vmatprep.subr.bf16.mxu1 %v1812_v0  ;;  %717 = vmatprep.subr.bf16.mxu0 %v1812_v0  ;;  %v1604_v2 = vld [vmem:[%s2283_s1] sm:$0xff]   ;;  %v1606_v4 = vld [vmem:[%s2283_s1 + $0x8] sm:$0xff]   ;;  %v1607_v5 = vld [vmem:[%s2283_s1 + $0x70] sm:$0xff]   ;;  %s1455_s25 = sadd.s32 16, %s1967_s3  ;;  %s1458_s23 = sadd.s32 32, %s1967_s3 }
  0x38   : > { %453 = vmatpush1.bf16.msra.mxu1 %v1603_v1  ;;  %718 = vmatpush1.bf16.msra.mxu0 %v1604_v2  ;;  %v1608_v6 = vld [vmem:[%s2283_s1 + $0x10] sm:$0xff]   ;;  %v1609_v7 = vld [vmem:[%s2283_s1 + $0x78] sm:$0xff]   ;;  %v1611_v9 = vld [vmem:[%s2283_s1 + $0x80] sm:$0xff]   ;;  %s237_s17 = sshra.s32 %s1455_s25, 3  ;;  %s2003_s25 = scalar_lea.vmem %s1933_s8, %s1967_s3 [#allocation2] }
  0x39   : > { %454 = vmatprep.subr.bf16.mxu1 %v1812_v0  ;;  %719 = vmatprep.subr.bf16.mxu0 %v1812_v0  ;;  %v1610_v8 = vld [vmem:[%s2283_s1 + $0x18] sm:$0xff]   ;;  %v1612_v10 = vld [vmem:[%s2283_s1 + $0x20] sm:$0xff]   ;;  %v1613_v11 = vld [vmem:[%s2283_s1 + $0x88] sm:$0xff]   ;;  %s1456_s24 = sshll.u32 %s237_s17, 3  ;;  %p178_p7 = scmp.lt.s32.totalorder %s1795_s13, 1 }
  0x3a   : > { %v1614_v12 = vld [vmem:[%s2283_s1 + $0x28] sm:$0xff]   ;;  %v1615_v13 = vld [vmem:[%s2283_s1 + $0x90] sm:$0xff]   ;;  %s1995_s30 = scalar_lea.vmem %s1933_s8, %s1456_s24 [#allocation2]  ;;  %v1617_v16 = vld [vmem:[%s2283_s1 + $0x98] sm:$0xff]   ;;  %s816_s24 = sshra.s32 %s1458_s23, 3 }
  0x3b   : > { %v1616_v14 = vld [vmem:[%s2283_s1 + $0x30] sm:$0xff]   ;;  %v1629_v15 = vld [vmem:[%s1995_s30 + $0x4] ss:$8 sps:$4 sm:$0xff]   ;;  %v1618_v18 = vld [vmem:[%s2283_s1 + $0x38] sm:$0xff]   ;;  %s1459_s3 = sshll.u32 %s816_s24, 3  ;;  %s2301_s13 = smov (!%p178_p7, %s1795_s13), 1 }
  0x3c   : > { %455 = vmatpush1.bf16.msra.mxu1 %v1605_v3  ;;  %720 = vmatpush1.bf16.msra.mxu0 %v1606_v4  ;;  %v1632_v17 = vld [vmem:[%s2003_s25 + $0x4] ss:$8 sps:$4 sm:$0xff]   ;;  %v1623_v23 = vld [vmem:[%s2283_s1 + $0xb0] sm:$0xff]   ;;  %v1625_v25 = vld [vmem:[%s2283_s1 + $0xb8] sm:$0xff]   ;;  %s2077_s29 = scalar_lea.vmem %s1933_s8, %s1459_s3 [#allocation2] }
  0x3d   : > { %456 = vmatprep.subr.bf16.mxu1 %v1812_v0  ;;  %721 = vmatprep.subr.bf16.mxu0 %v1812_v0  ;;  %v1619_v19 = vld [vmem:[%s2283_s1 + $0xa0] sm:$0xff]   ;;  %v1621_v21 = vld [vmem:[%s2283_s1 + $0xa8] sm:$0xff]   ;;  %v1624_v24 = vld [vmem:[%s2283_s1 + $0x50] sm:$0xff]  }
  0x3e   : > { %1344 = vmatprep.mubr.msk.bf16.mxu1 %vm427_vm0, %v1629_v15  ;;  %1380 = vmatprep.mubr.msk.bf16.mxu0 %vm427_vm0, %v1632_v17  ;;  %v1620_v20 = vld [vmem:[%s2283_s1 + $0x40] sm:$0xff]   ;;  %v1622_v22 = vld [vmem:[%s2283_s1 + $0x48] sm:$0xff]   ;;  %v1626_v26 = vld [vmem:[%s2283_s1 + $0x58] sm:$0xff]  }
  0x3f   : > { %v1627_v27 = vld [vmem:[%s1995_s30] ss:$8 sps:$4 sm:$0xff]   ;;  %v1634_v30 = vld [vmem:[%s1995_s30 + $0x14] ss:$8 sps:$4 sm:$0xff]   ;;  %v1639_v33 = vld [vmem:[%s1995_s30 + $0x10] ss:$8 sps:$4 sm:$0xff]  }
  0x40   : > { %457 = vmatpush1.bf16.msra.mxu1 %v1607_v5  ;;  %722 = vmatpush1.bf16.msra.mxu0 %v1608_v6  ;;  %v1630_v28 = vld [vmem:[%s2003_s25] ss:$8 sps:$4 sm:$0xff]   ;;  %v1636_v31 = vld [vmem:[%s2003_s25 + $0x14] ss:$8 sps:$4 sm:$0xff]   ;;  %v1640_v34 = vld [vmem:[%s2003_s25 + $0x10] ss:$8 sps:$4 sm:$0xff]  }
  0x41   : > { %458 = vmatprep.subr.bf16.mxu1 %v1812_v0  ;;  %723 = vmatprep.subr.bf16.mxu0 %v1812_v0  ;;  %v1633_v29 = vld [vmem:[%s2283_s1 + $0xc0] sm:$0xff]   ;;  %v1638_v32 = vld [vmem:[%s2283_s1 + $0xc8] sm:$0xff]   ;;  %v1641_v35 = vld [vmem:[%s2283_s1 + $0xd0] sm:$0xff]  }
  0x42   : > { %v1642_v36 = vld [vmem:[%s1995_s30 + $0x24] ss:$8 sps:$4 sm:$0xff]   ;;  %v1648_v38 = vld [vmem:[%s2283_s1 + $0xd8] sm:$0xff]   ;;  %v1646_v39 = vld [vmem:[%s1995_s30 + $0x20] ss:$8 sps:$4 sm:$0xff]  }
  0x43   : > { %v1644_v37 = vld [vmem:[%s2003_s25 + $0x24] ss:$8 sps:$4 sm:$0xff]   ;;  %v1647_v40 = vld [vmem:[%s2003_s25 + $0x20] ss:$8 sps:$4 sm:$0xff]   ;;  %v1649_v41 = vld [vmem:[%s1995_s30 + $0x34] ss:$8 sps:$4 sm:$0xff]  }
  0x44   : > { %459 = vmatpush1.bf16.msra.mxu1 %v1609_v7  ;;  %724 = vmatpush1.bf16.msra.mxu0 %v1610_v8  ;;  %v1651_v42 = vld [vmem:[%s2003_s25 + $0x34] ss:$8 sps:$4 sm:$0xff]   ;;  %v1653_v43 = vld [vmem:[%s2283_s1 + $0xe0] sm:$0xff]   ;;  %v1656_v44 = vld [vmem:[%s2283_s1 + $0xe8] sm:$0xff]  }
  0x45   : > { %460 = vmatprep.subr.bf16.mxu1 %v1812_v0  ;;  %725 = vmatprep.subr.bf16.mxu0 %v1812_v0  ;;  %v1654_v45 = vld [vmem:[%s1995_s30 + $0x30] ss:$8 sps:$4 sm:$0xff]   ;;  %v1657_v47 = vld [vmem:[%s1995_s30 + $0x44] ss:$8 sps:$4 sm:$0xff]   ;;  %v1661_v51 = vld [vmem:[%s1995_s30 + $0x40] ss:$8 sps:$4 sm:$0xff]  }
  0x46   : > { %v1655_v46 = vld [vmem:[%s2003_s25 + $0x30] ss:$8 sps:$4 sm:$0xff]   ;;  %v1659_v48 = vld [vmem:[%s2003_s25 + $0x44] ss:$8 sps:$4 sm:$0xff]   ;;  %v1662_v52 = vld [vmem:[%s2003_s25 + $0x40] ss:$8 sps:$4 sm:$0xff]  }
  0x47   : > { %v1663_v49 = vld [vmem:[%s2283_s1 + $0xf0] sm:$0xff]   ;;  %v1668_v50 = vld [vmem:[%s2283_s1 + $0xf8] sm:$0xff]   ;;  %v1671_v55 = vld [vmem:[%s2283_s1 + $0x100] sm:$0xff]  }
  0x48   : > { %461 = vmatpush1.bf16.msra.mxu1 %v1611_v9  ;;  %726 = vmatpush1.bf16.msra.mxu0 %v1612_v10  ;;  %v1664_v53 = vld [vmem:[%s1995_s30 + $0x54] ss:$8 sps:$4 sm:$0xff]   ;;  %v1678_v56 = vld [vmem:[%s2283_s1 + $0x108] sm:$0xff]   ;;  %v1669_v57 = vld [vmem:[%s1995_s30 + $0x50] ss:$8 sps:$4 sm:$0xff]  }
  0x49   : > { %462 = vmatprep.subr.bf16.mxu1 %v1812_v0  ;;  %727 = vmatprep.subr.bf16.mxu0 %v1812_v0  ;;  %v1666_v54 = vld [vmem:[%s2003_s25 + $0x54] ss:$8 sps:$4 sm:$0xff]   ;;  %v1670_v58 = vld [vmem:[%s2003_s25 + $0x50] ss:$8 sps:$4 sm:$0xff]   ;;  %v1672_v59 = vld [vmem:[%s1995_s30 + $0x64] ss:$8 sps:$4 sm:$0xff]  }
  0x4a   : > { %v1674_v60 = vld [vmem:[%s2003_s25 + $0x64] ss:$8 sps:$4 sm:$0xff]   ;;  %v1683_v61 = vld [vmem:[%s2283_s1 + $0x110] sm:$0xff]   ;;  %v1686_v62 = vld [vmem:[%s2283_s1 + $0x118] sm:$0xff]  }
  0x4b   : > { %v1676_v63 = vld [vmem:[%s1995_s30 + $0x60] ss:$8 sps:$4 sm:$0xff]   ;;  %v1679_v2 = vld [vmem:[%s1995_s30 + $0x74] ss:$8 sps:$4 sm:$0xff]   ;;  %v1684_v4 = vld [vmem:[%s1995_s30 + $0x70] ss:$8 sps:$4 sm:$0xff]  }
  0x4c   : > { %463 = vmatpush1.bf16.msra.mxu1 %v1613_v11  ;;  %728 = vmatpush1.bf16.msra.mxu0 %v1614_v12  ;;  %v1677_v1 = vld [vmem:[%s2003_s25 + $0x60] ss:$8 sps:$4 sm:$0xff]   ;;  %v1681_v3 = vld [vmem:[%s2003_s25 + $0x74] ss:$8 sps:$4 sm:$0xff]   ;;  %v1685_v5 = vld [vmem:[%s2003_s25 + $0x70] ss:$8 sps:$4 sm:$0xff]  }
  0x4d   : > { %464 = vmatprep.subr.bf16.mxu1 %v1812_v0  ;;  %729 = vmatprep.subr.bf16.mxu0 %v1812_v0  ;;  %v1689_v6 = vld [vmem:[%s2077_s29 + $0x4] ss:$8 sps:$4 sm:$0xff]   ;;  %v1690_v7 = vld [vmem:[%s2077_s29 + $0x40] ss:$8 sps:$4 sm:$0xff]   ;;  %v1695_v9 = vld [vmem:[%s2077_s29 + $0x54] ss:$8 sps:$4 sm:$0xff]  }
  0x4e   : > { %v1687_v8 = vld [vmem:[%s2077_s29] ss:$8 sps:$4 sm:$0xff]   ;;  %v1693_v10 = vld [vmem:[%s2077_s29 + $0x14] ss:$8 sps:$4 sm:$0xff]   ;;  %v1698_v11 = vld [vmem:[%s2077_s29 + $0x50] ss:$8 sps:$4 sm:$0xff]  }
  0x4f   : > { %v1697_v12 = vld [vmem:[%s2077_s29 + $0x10] ss:$8 sps:$4 sm:$0xff]   ;;  %v1704_v15 = vld [vmem:[%s2077_s29 + $0x60] ss:$8 sps:$4 sm:$0xff]   ;;  %v1707_v17 = vld [vmem:[%s2077_s29 + $0x74] ss:$8 sps:$4 sm:$0xff]  }
  0x50   : > { %465 = vmatpush1.bf16.msra.mxu1 %v1615_v13  ;;  %730 = vmatpush1.bf16.msra.mxu0 %v1616_v14  ;;  %v1701_v13 = vld [vmem:[%s2077_s29 + $0x64] ss:$8 sps:$4 sm:$0xff]   ;;  %s1282_s30 = sshll.u32 %s1791_s12, 4  ;;  %s1283_s25 = sshll.u32 %s2301_s13, 5 }
  0x51   : > { %466 = vmatprep.subr.bf16.mxu1 %v1812_v0  ;;  %731 = vmatprep.subr.bf16.mxu0 %v1812_v0  ;;  %v1699_v14 = vld [vmem:[%s2077_s29 + $0x24] ss:$8 sps:$4 sm:$0xff]   ;;  %p180_p10 = scmp.lt.s32.totalorder %s1282_s30, 31 }
  0x53   : > { %s2303_s30 = smov (!%p180_p10, %s1282_s30), 31 }
  0x54   : > { %467 = vmatpush1.bf16.msra.mxu1 %v1617_v16  ;;  %732 = vmatpush1.bf16.msra.mxu0 %v1618_v18  ;;  %v1703_v16 = vld [vmem:[%s2077_s29 + $0x20] ss:$8 sps:$4 sm:$0xff]   ;;  %v1705_v18 = vld [vmem:[%s2077_s29 + $0x34] ss:$8 sps:$4 sm:$0xff]   ;;  %s183_s12 = sadd.s32 %s1283_s25, %s2303_s30 }
  0x55   : > { %468 = vmatprep.subr.bf16.mxu1 %v1812_v0  ;;  %733 = vmatprep.subr.bf16.mxu0 %v1812_v0 }
  0x58   : > { %469 = vmatpush1.bf16.msra.mxu1 %v1619_v19  ;;  %734 = vmatpush1.bf16.msra.mxu0 %v1620_v20  ;;  %v1710_v19 = vld [vmem:[%s2077_s29 + $0x70] ss:$8 sps:$4 sm:$0xff]  }
  0x59   : > { %470 = vmatprep.subr.bf16.mxu1 %v1812_v0  ;;  %735 = vmatprep.subr.bf16.mxu0 %v1812_v0  ;;  %v1709_v20 = vld [vmem:[%s2077_s29 + $0x30] ss:$8 sps:$4 sm:$0xff]  }
  0x5c   : > { %471 = vmatpush1.bf16.msra.mxu1 %v1621_v21  ;;  %736 = vmatpush1.bf16.msra.mxu0 %v1622_v22 }
  0x5d   : > { %472 = vmatprep.subr.bf16.mxu1 %v1812_v0  ;;  %737 = vmatprep.subr.bf16.mxu0 %v1812_v0 }
  0x60   : > { %473 = vmatpush1.bf16.msra.mxu1 %v1623_v23  ;;  %738 = vmatpush1.bf16.msra.mxu0 %v1624_v24 }
  0x61   : > { %474 = vmatprep.subr.bf16.mxu1 %v1812_v0  ;;  %739 = vmatprep.subr.bf16.mxu0 %v1812_v0 }
  0x64   : > { %475 = vmatpush1.bf16.msra.mxu1 %v1625_v25  ;;  %740 = vmatpush1.bf16.msra.mxu0 %v1626_v26 }
  0x65   : > { %1462 = vmatprep.subr.bf16.mxu1 %v1812_v0  ;;  %1030 = vmatprep.subr.bf16.mxu0 %v1812_v0 }
  0x67   : > { %485 = vmatmul.mubr.bf16.vlgmr.msra.gmra.mrb[0].mxu1 %v1627_v27  ;;  %750 = vmatmul.mubr.bf16.vlgmr.msra.gmra.mrb[0].mxu0 %v1630_v28 }
  0x68   : > { %1474 = vmatpush1.bf16.msra.mxu1 %v1633_v29  ;;  %1031 = vmatpush1.bf16.msra.mxu0 %v1633_v29 }
  0x69   : > { %1463 = vmatprep.subr.bf16.mxu1 %v1812_v0  ;;  %1032 = vmatprep.subr.bf16.mxu0 %v1812_v0 }
  0x6a   : > { %1345 = vmatprep.mubr.msk.bf16.mxu1 %vm427_vm0, %v1634_v30  ;;  %1381 = vmatprep.mubr.msk.bf16.mxu0 %vm427_vm0, %v1636_v31 }
  0x6c   : > { %1475 = vmatpush1.bf16.msra.mxu1 %v1638_v32  ;;  %1033 = vmatpush1.bf16.msra.mxu0 %v1638_v32 }
  0x6d   : > { %1464 = vmatprep.subr.bf16.mxu1 %v1812_v0  ;;  %1034 = vmatprep.subr.bf16.mxu0 %v1812_v0 }
  0x6f   : > { %493 = vmatmul.mubr.bf16.gmra.mrb[4].mxu1 %v1639_v33  ;;  %758 = vmatmul.mubr.bf16.gmra.mrb[4].mxu0 %v1640_v34 }
  0x70   : > { %1476 = vmatpush1.bf16.msra.mxu1 %v1641_v35  ;;  %1035 = vmatpush1.bf16.msra.mxu0 %v1641_v35 }
  0x71   : > { %1346 = vmatprep.mubr.msk.bf16.mxu1 %vm427_vm0, %v1642_v36  ;;  %1382 = vmatprep.mubr.msk.bf16.mxu0 %vm427_vm0, %v1644_v37 }
  0x72   : > { %1036 = vmatprep.subr.bf16.mxu0 %v1812_v0  ;;  %1465 = vmatprep.subr.bf16.mxu1 %v1812_v0 }
  0x74   : > { %1477 = vmatpush1.bf16.msra.mxu1 %v1648_v38  ;;  %1037 = vmatpush1.bf16.msra.mxu0 %v1648_v38 }
  0x75   : > { %1466 = vmatprep.subr.bf16.mxu1 %v1812_v0  ;;  %1038 = vmatprep.subr.bf16.mxu0 %v1812_v0 }
  0x77   : > { %501 = vmatmul.mubr.bf16.gmra.mrb[8].mxu1 %v1646_v39  ;;  %766 = vmatmul.mubr.bf16.gmra.mrb[8].mxu0 %v1647_v40 }
  0x78   : > { %1347 = vmatprep.mubr.msk.bf16.mxu1 %vm427_vm0, %v1649_v41  ;;  %1383 = vmatprep.mubr.msk.bf16.mxu0 %vm427_vm0, %v1651_v42 }
  0x79   : > { %1039 = vmatpush1.bf16.msra.mxu0 %v1653_v43  ;;  %1478 = vmatpush1.bf16.msra.mxu1 %v1653_v43 }
  0x7a   : > { %1040 = vmatprep.subr.bf16.mxu0 %v1812_v0  ;;  %1467 = vmatprep.subr.bf16.mxu1 %v1812_v0 }
  0x7d   : > { %1041 = vmatpush1.bf16.msra.mxu0 %v1656_v44  ;;  %1479 = vmatpush1.bf16.msra.mxu1 %v1656_v44 }
  0x7e   : > { %1042 = vmatprep.subr.bf16.mxu0 %v1812_v0  ;;  %1468 = vmatprep.subr.bf16.mxu1 %v1812_v0 }
  0x7f   : > { %509 = vmatmul.mubr.bf16.gmra.mrb[12].mxu1 %v1654_v45  ;;  %774 = vmatmul.mubr.bf16.gmra.mrb[12].mxu0 %v1655_v46 }
  0x80   : > { %1348 = vmatprep.mubr.msk.bf16.mxu1 %vm427_vm0, %v1657_v47  ;;  %1384 = vmatprep.mubr.msk.bf16.mxu0 %vm427_vm0, %v1659_v48 }
  0x81   : > { %1043 = vmatpush1.bf16.msra.mxu0 %v1663_v49  ;;  %1480 = vmatpush1.bf16.msra.mxu1 %v1663_v49 }
  0x82   : > { %1044 = vmatprep.subr.bf16.mxu0 %v1812_v0  ;;  %1469 = vmatprep.subr.bf16.mxu1 %v1812_v0 }
  0x85   : > { %1045 = vmatpush1.bf16.msra.mxu0 %v1668_v50  ;;  %1481 = vmatpush1.bf16.msra.mxu1 %v1668_v50 }
  0x86   : > { %1046 = vmatprep.subr.bf16.mxu0 %v1812_v0  ;;  %1470 = vmatprep.subr.bf16.mxu1 %v1812_v0 }
  0x87   : > { %517 = vmatmul.mubr.bf16.gmra.mrb[16].mxu1 %v1661_v51  ;;  %782 = vmatmul.mubr.bf16.gmra.mrb[16].mxu0 %v1662_v52 }
  0x88   : > { %1349 = vmatprep.mubr.msk.bf16.mxu1 %vm427_vm0, %v1664_v53  ;;  %1385 = vmatprep.mubr.msk.bf16.mxu0 %vm427_vm0, %v1666_v54 }
  0x89   : > { %1047 = vmatpush1.bf16.msra.mxu0 %v1671_v55  ;;  %1482 = vmatpush1.bf16.msra.mxu1 %v1671_v55 }
  0x8a   : > { %1048 = vmatprep.subr.bf16.mxu0 %v1812_v0  ;;  %1471 = vmatprep.subr.bf16.mxu1 %v1812_v0 }
  0x8d   : > { %1049 = vmatpush1.bf16.msra.mxu0 %v1678_v56  ;;  %1483 = vmatpush1.bf16.msra.mxu1 %v1678_v56 }
  0x8e   : > { %1050 = vmatprep.subr.bf16.mxu0 %v1812_v0  ;;  %1472 = vmatprep.subr.bf16.mxu1 %v1812_v0 }
  0x8f   : > { %525 = vmatmul.mubr.bf16.gmra.mrb[20].mxu1 %v1669_v57  ;;  %790 = vmatmul.mubr.bf16.gmra.mrb[20].mxu0 %v1670_v58 }
  0x90   : > { %1350 = vmatprep.mubr.msk.bf16.mxu1 %vm427_vm0, %v1672_v59  ;;  %1386 = vmatprep.mubr.msk.bf16.mxu0 %vm427_vm0, %v1674_v60 }
  0x91   : > { %1051 = vmatpush1.bf16.msra.mxu0 %v1683_v61  ;;  %1484 = vmatpush1.bf16.msra.mxu1 %v1683_v61 }
  0x92   : > { %1052 = vmatprep.subr.bf16.mxu0 %v1812_v0  ;;  %1473 = vmatprep.subr.bf16.mxu1 %v1812_v0  ;;  %v1692_v0 = vld [vmem:[%s2077_s29 + $0x44] ss:$8 sps:$4 sm:$0xff]   ;;  %s1284_s29 = sshll.u32 %s183_s12, 3 }
  0x93   : > { %s2212_s21 = scalar_lea.vmem %s2284_s2, %s1284_s29 }
  0x95   : > { %1053 = vmatpush1.bf16.msra.mxu0 %v1686_v62  ;;  %1485 = vmatpush1.bf16.msra.mxu1 %v1686_v62 }
  0x97   : > { %533 = vmatmul.mubr.bf16.gmra.mrb[24].mxu1 %v1676_v63  ;;  %798 = vmatmul.mubr.bf16.gmra.mrb[24].mxu0 %v1677_v1 }
  0x98   : > { %1351 = vmatprep.mubr.msk.bf16.mxu1 %vm427_vm0, %v1679_v2  ;;  %1387 = vmatprep.mubr.msk.bf16.mxu0 %vm427_vm0, %v1681_v3 }
  0x9f   : > { %541 = vmatmul.mubr.bf16.gmra.mrb[28].mxu1 %v1684_v4  ;;  %806 = vmatmul.mubr.bf16.gmra.mrb[28].mxu0 %v1685_v5 }
  0xa0   : > { %1447 = vmatprep.mubr.msk.bf16.mxu1 %vm427_vm0, %v1692_v0  ;;  %1443 = vmatprep.mubr.msk.bf16.mxu0 %vm427_vm0, %v1689_v6 }
  0xa7   : > { %1095 = vmatmul.mubr.bf16.vlgmr.msra.gmra.mrb[32].mxu1 %v1690_v7  ;;  %1063 = vmatmul.mubr.bf16.vlgmr.msra.gmra.mrb[0].mxu0 %v1687_v8 }
  0xa8   : > { %1448 = vmatprep.mubr.msk.bf16.mxu1 %vm427_vm0, %v1695_v9  ;;  %1444 = vmatprep.mubr.msk.bf16.mxu0 %vm427_vm0, %v1693_v10 }
  0xaf   : > { %1103 = vmatmul.mubr.bf16.gmra.mrb[36].mxu1 %v1698_v11  ;;  %1071 = vmatmul.mubr.bf16.gmra.mrb[4].mxu0 %v1697_v12 }
  0xb0   : > { %1449 = vmatprep.mubr.msk.bf16.mxu1 %vm427_vm0, %v1701_v13  ;;  %1445 = vmatprep.mubr.msk.bf16.mxu0 %vm427_vm0, %v1699_v14 }
  0xb7   : > { %1111 = vmatmul.mubr.bf16.gmra.mrb[40].mxu1 %v1704_v15  ;;  %1079 = vmatmul.mubr.bf16.gmra.mrb[8].mxu0 %v1703_v16 }
  0xb8   : > { %1450 = vmatprep.mubr.msk.bf16.mxu1 %vm427_vm0, %v1707_v17  ;;  %1446 = vmatprep.mubr.msk.bf16.mxu0 %vm427_vm0, %v1705_v18 }
  0xbf   : > { %1119 = vmatmul.mubr.bf16.gmra.mrb[44].mxu1 %v1710_v19  ;;  %1087 = vmatmul.mubr.bf16.gmra.mrb[12].mxu0 %v1709_v20 }
 0x13a   : > { %v2182_v21 = vpop.f32.mrb[0].mxu1 }
 0x13b   : > { %v488_v22 = vpop.f32.mrb[1].mxu1 }
 0x13c   : > { %v2184_v23 = vpop.f32.mrb[2].mxu1 }
 0x13d   : > { %v491_v24 = vpop.f32.mrb[3].mxu1 }
 0x142   : > { %v2186_v25 = vpop.f32.mrb[4].mxu1 }
 0x143   : > { %v496_v26 = vpop.f32.mrb[5].mxu1 }
 0x144   : > { %v2188_v27 = vpop.f32.mrb[6].mxu1 }
 0x145   : > { %v499_v28 = vpop.f32.mrb[7].mxu1 }
 0x14a   : > { %v2190_v29 = vpop.f32.mrb[8].mxu1 }
 0x14b   : > { %v504_v30 = vpop.f32.mrb[9].mxu1 }
 0x14c   : > { %v2192_v31 = vpop.f32.mrb[10].mxu1 }
 0x14d   : > { %v507_v32 = vpop.f32.mrb[11].mxu1 }
 0x152   : > { %v2194_v33 = vpop.f32.mrb[12].mxu1 }
 0x153   : > { %v512_v34 = vpop.f32.mrb[13].mxu1 }
 0x154   : > { %v2196_v35 = vpop.f32.mrb[14].mxu1 }
 0x155   : > { %v515_v36 = vpop.f32.mrb[15].mxu1 }
 0x15a   : > { %v518_v37 = vpop.f32.mrb[16].mxu1  ;;  %v783_v38 = vpop.f32.mrb[16].mxu0 }
 0x15b   : > { %v520_v39 = vpop.f32.mrb[17].mxu1  ;;  %v784_v40 = vadd.f32 %v783_v38, %v518_v37  ;;  %v785_v41 = vpop.f32.mrb[17].mxu0 }
 0x15c   : > { %v521_v42 = vpop.f32.mrb[18].mxu1  ;;  %v786_v43 = vpop.f32.mrb[18].mxu0 }
 0x15d   : > { %v523_v44 = vpop.f32.mrb[19].mxu1  ;;  %v787_v45 = vadd.f32 %v786_v43, %v521_v42  ;;  %v788_v46 = vpop.f32.mrb[19].mxu0 }
 0x162   : > { %v526_v47 = vpop.f32.mrb[20].mxu1  ;;  %v791_v48 = vpop.f32.mrb[20].mxu0 }
 0x163   : > { %v528_v49 = vpop.f32.mrb[21].mxu1  ;;  %v792_v50 = vadd.f32 %v791_v48, %v526_v47  ;;  %v793_v51 = vpop.f32.mrb[21].mxu0 }
 0x164   : > { %v529_v52 = vpop.f32.mrb[22].mxu1  ;;  %v794_v53 = vpop.f32.mrb[22].mxu0 }
 0x165   : > { %v531_v54 = vpop.f32.mrb[23].mxu1  ;;  %v795_v55 = vadd.f32 %v794_v53, %v529_v52  ;;  %v796_v56 = vpop.f32.mrb[23].mxu0 }
 0x16a   : > { %v534_v57 = vpop.f32.mrb[24].mxu1  ;;  %v799_v58 = vpop.f32.mrb[24].mxu0 }
 0x16b   : > { %v536_v59 = vpop.f32.mrb[25].mxu1  ;;  %v2200_v60 = vadd.f32 %v799_v58, %v534_v57  ;;  %v801_v61 = vpop.f32.mrb[25].mxu0 }
 0x16c   : > { %v537_v62 = vpop.f32.mrb[26].mxu1  ;;  %v802_v63 = vpop.f32.mrb[26].mxu0 }
 0x16d   : > { %v539_v1 = vpop.f32.mrb[27].mxu1  ;;  %v2202_v2 = vadd.f32 %v802_v63, %v537_v62  ;;  %v804_v3 = vpop.f32.mrb[27].mxu0 }
 0x172   : > { %v542_v4 = vpop.f32.mrb[28].mxu1  ;;  %v807_v5 = vpop.f32.mrb[28].mxu0 }
 0x173   : > { %v544_v0 = vpop.f32.mrb[29].mxu1  ;;  %v2205_v6 = vadd.f32 %v807_v5, %v542_v4  ;;  %v809_v7 = vpop.f32.mrb[29].mxu0 }
 0x174   : > { %v545_v8 = vpop.f32.mrb[30].mxu1  ;;  %v810_v9 = vpop.f32.mrb[30].mxu0 }
 0x175   : > { %v547_v10 = vpop.f32.mrb[31].mxu1  ;;  %v2207_v11 = vadd.f32 %v810_v9, %v545_v8  ;;  %v812_v12 = vpop.f32.mrb[31].mxu0 }
 0x17a   : > { %v1096_v13 = vpop.f32.mrb[32].mxu1  ;;  %v1064_v14 = vpop.f32.mrb[0].mxu0 }
 0x17b   : > { %v1135_v15 = vadd.f32 %v1096_v13, %v784_v40  ;;  %v1098_v16 = vpop.f32.mrb[33].mxu1  ;;  %v1486_v17 = vadd.f32 %v1064_v14, %v2182_v21  ;;  %v1066_v18 = vpop.f32.mrb[1].mxu0 }
 0x17c   : > { %v1099_v19 = vpop.f32.mrb[34].mxu1  ;;  %v1067_v22 = vpop.f32.mrb[2].mxu0 }
 0x17d   : > { %v1151_v20 = vmax.f32 %v1135_v15, 0.0  ;;  %v1136_v24 = vadd.f32 %v1099_v19, %v787_v45  ;;  %v1101_v26 = vpop.f32.mrb[35].mxu1  ;;  %v1143_v28 = vmax.f32 %v1486_v17, 0.0  ;;  %v1487_v30 = vadd.f32 %v1067_v22, %v2184_v23  ;;  %v1069_v32 = vpop.f32.mrb[3].mxu0 }
 0x17f   : > { %1167 = vst.msk [vmem:[%s2212_s21 + $0x40] sm:$0xff] %vm427_vm0, %v1151_v20  ;;  %v1152_v34 = vmax.f32 %v1136_v24, 0.0  ;;  %1159 = vst.msk [vmem:[%s2212_s21] sm:$0xff] %vm427_vm0, %v1143_v28  ;;  %v1144_v36 = vmax.f32 %v1487_v30, 0.0 }
 0x181   : > { %1168 = vst.msk [vmem:[%s2212_s21 + $0x48] sm:$0xff] %vm427_vm0, %v1152_v34  ;;  %1160 = vst.msk [vmem:[%s2212_s21 + $0x8] sm:$0xff] %vm427_vm0, %v1144_v36 }
 0x182   : > { %v1104_v21 = vpop.f32.mrb[36].mxu1  ;;  %v1072_v37 = vpop.f32.mrb[4].mxu0 }
 0x183   : > { %v1137_v38 = vadd.f32 %v1104_v21, %v792_v50  ;;  %v1106_v39 = vpop.f32.mrb[37].mxu1  ;;  %v1488_v23 = vadd.f32 %v1072_v37, %v2186_v25  ;;  %v1074_v40 = vpop.f32.mrb[5].mxu0 }
 0x184   : > { %v1107_v41 = vpop.f32.mrb[38].mxu1  ;;  %v1075_v43 = vpop.f32.mrb[6].mxu0 }
 0x185   : > { %v1153_v42 = vmax.f32 %v1137_v38, 0.0  ;;  %v1138_v44 = vadd.f32 %v1107_v41, %v795_v55  ;;  %v1109_v45 = vpop.f32.mrb[39].mxu1  ;;  %v1145_v46 = vmax.f32 %v1488_v23, 0.0  ;;  %v1489_v47 = vadd.f32 %v1075_v43, %v2188_v27  ;;  %v1077_v48 = vpop.f32.mrb[7].mxu0 }
 0x187   : > { %1169 = vst.msk [vmem:[%s2212_s21 + $0x50] sm:$0xff] %vm427_vm0, %v1153_v42  ;;  %v1154_v49 = vmax.f32 %v1138_v44, 0.0  ;;  %1161 = vst.msk [vmem:[%s2212_s21 + $0x10] sm:$0xff] %vm427_vm0, %v1145_v46  ;;  %v1146_v50 = vmax.f32 %v1489_v47, 0.0 }
 0x189   : > { %1170 = vst.msk [vmem:[%s2212_s21 + $0x58] sm:$0xff] %vm427_vm0, %v1154_v49  ;;  %1162 = vst.msk [vmem:[%s2212_s21 + $0x18] sm:$0xff] %vm427_vm0, %v1146_v50 }
 0x18a   : > { %v1112_v25 = vpop.f32.mrb[40].mxu1  ;;  %v1080_v51 = vpop.f32.mrb[8].mxu0 }
 0x18b   : > { %v1139_v52 = vadd.f32 %v1112_v25, %v2200_v60  ;;  %v1114_v53 = vpop.f32.mrb[41].mxu1  ;;  %v1490_v27 = vadd.f32 %v1080_v51, %v2190_v29  ;;  %v1082_v54 = vpop.f32.mrb[9].mxu0 }
 0x18c   : > { %v1115_v55 = vpop.f32.mrb[42].mxu1  ;;  %v1083_v57 = vpop.f32.mrb[10].mxu0 }
 0x18d   : > { %v1155_v56 = vmax.f32 %v1139_v52, 0.0  ;;  %v1140_v58 = vadd.f32 %v1115_v55, %v2202_v2  ;;  %v1117_v59 = vpop.f32.mrb[43].mxu1  ;;  %v1147_v61 = vmax.f32 %v1490_v27, 0.0  ;;  %v1491_v62 = vadd.f32 %v1083_v57, %v2192_v31  ;;  %v1085_v63 = vpop.f32.mrb[11].mxu0 }
 0x18f   : > { %1171 = vst.msk [vmem:[%s2212_s21 + $0x60] sm:$0xff] %vm427_vm0, %v1155_v56  ;;  %v1156_v1 = vmax.f32 %v1140_v58, 0.0  ;;  %1163 = vst.msk [vmem:[%s2212_s21 + $0x20] sm:$0xff] %vm427_vm0, %v1147_v61  ;;  %v1148_v60 = vmax.f32 %v1491_v62, 0.0 }
 0x191   : > { %1172 = vst.msk [vmem:[%s2212_s21 + $0x68] sm:$0xff] %vm427_vm0, %v1156_v1  ;;  %1164 = vst.msk [vmem:[%s2212_s21 + $0x28] sm:$0xff] %vm427_vm0, %v1148_v60 }
 0x192   : > { %v1120_v29 = vpop.f32.mrb[44].mxu1  ;;  %v1088_v3 = vpop.f32.mrb[12].mxu0 }
 0x193   : > { %v1141_v2 = vadd.f32 %v1120_v29, %v2205_v6  ;;  %v1122_v4 = vpop.f32.mrb[45].mxu1  ;;  %v1492_v31 = vadd.f32 %v1088_v3, %v2194_v33  ;;  %v1090_v5 = vpop.f32.mrb[13].mxu0 }
 0x194   : > { %v1123_v0 = vpop.f32.mrb[46].mxu1  ;;  %v1091_v8 = vpop.f32.mrb[14].mxu0 }
 0x195   : > { %v1157_v7 = vmax.f32 %v1141_v2, 0.0  ;;  %v1142_v9 = vadd.f32 %v1123_v0, %v2207_v11  ;;  %v1125_v10 = vpop.f32.mrb[47].mxu1  ;;  %v1149_v12 = vmax.f32 %v1492_v31, 0.0  ;;  %v1493_v13 = vadd.f32 %v1091_v8, %v2196_v35  ;;  %v1093_v14 = vpop.f32.mrb[15].mxu0 }
 0x197   : > { %1173 = vst.msk [vmem:[%s2212_s21 + $0x70] sm:$0xff] %vm427_vm0, %v1157_v7  ;;  %v1158_v15 = vmax.f32 %v1142_v9, 0.0  ;;  %1165 = vst.msk [vmem:[%s2212_s21 + $0x30] sm:$0xff] %vm427_vm0, %v1149_v12  ;;  %v1150_v6 = vmax.f32 %v1493_v13, 0.0 }
 0x199   : > { %1174 = vst.msk [vmem:[%s2212_s21 + $0x78] sm:$0xff] %vm427_vm0, %v1158_v15  ;;  %1166 = vst.msk [vmem:[%s2212_s21 + $0x38] sm:$0xff] %vm427_vm0, %v1150_v6 }
 0x19a PF: > { %s15_s16 = sadd.s32 1, %s1807_s16   ;;  %s2287_s9 = smov %s1783_s10 }
 0x19b   : > { %p12_p5 = scmp.ge.s32.totalorder %s15_s16, 6   ;;  %s2288_s10 = smov %s1787_s11 }
 0x19c   : > { %s2289_s11 = smov %s1892_s26  ;;  %s2290_s12 = smov %s1799_s14 }
 0x19d   : > { %s2291_s13 = smov %s1803_s15  ;;  %s2292_s14 = smov %s2295_s18 }
 0x19e   : > { %s2293_s15 = smov %s2299_s19  ;;  %14 = sbr.rel (!%p12_p5) target bundleno = 5 (0x5), region = 73 }
 0x1a5   :  { %1205 = vsyncpa [#allocation3], 1 }
 0x1a6   :  { %1207 = vsyncpa [#allocation3 + $0x1], 1 }

</bundles_post_ra>
